<compile_context>
chip_gen: v7x
topology: tpu7x:2x2x1
jax: 0.10.0
libtpu: 0.0.40
codegen_flags: <defaults>
</compile_context>

<pallas_src>
import jax
import jax.numpy as jnp
from jax.experimental import pallas as pl
from jax.experimental.pallas import tpu as pltpu


def make_ae_kernel(n_layers, compute_dtype):
    """Fused autoencoder forward: chain of (matmul + bias + ReLU) layers."""

    def kernel(*refs):
        x_ref = refs[0]
        out_ref = refs[-1]
        param_refs = refs[1:-1]                   # interleaved [w0, b0, w1, b1, ...]
        # f32 -> bf16 cast happens here (in-VMEM), not in the wrapper.
        h = x_ref[...].astype(compute_dtype)
        for l in range(n_layers):
            w = param_refs[2 * l][...]            # (din, dout), compute_dtype (bf16)
            b = param_refs[2 * l + 1][...]        # (1, dout),   float32
            acc = jnp.dot(h, w, preferred_element_type=jnp.float32) + b
            acc = jnp.maximum(acc, 0.0)           # ReLU after every Linear (f32)
            # Downcast only when feeding the next MXU op; keep last layer in f32
            # so the final store rounds exactly once.
            h = acc if l == n_layers - 1 else acc.astype(compute_dtype)
        out_ref[...] = h.astype(out_ref.dtype)

    return kernel


def init_autoencoder_params(key, dims):
    """Deterministic init mimicking PyTorch Linear default (uniform +-1/sqrt(fan_in)).

    Weights are stored pre-transposed as (in, out) so the kernel computes h @ W + b.
    """
    layer_dims = []
    for i in range(len(dims) - 1):                 # encoder
        layer_dims.append((dims[i], dims[i + 1]))
    for i in range(len(dims) - 1, 0, -1):          # decoder
        layer_dims.append((dims[i], dims[i - 1]))

    params = []
    for (din, dout) in layer_dims:
        key, kw, kb = jax.random.split(key, 3)
        bound = 1.0 / (din ** 0.5)
        w = jax.random.uniform(kw, (din, dout), jnp.float32, -bound, bound)
        b = jax.random.uniform(kb, (1, dout), jnp.float32, -bound, bound)
        params.append((w, b))
    return params


def _round_up(v, m):
    return (v + m - 1) // m * m


def autoencoder_forward(x, params, *, block_batch=4096,
                        compute_dtype=jnp.bfloat16, out_dtype=jnp.bfloat16):
    """Run the whole autoencoder forward in a single batch-tiled Pallas kernel."""
    assert block_batch % 16 == 0, "block_batch must be a multiple of 16 (bf16 tile)"
    n_layers = len(params)
    batch, in_dim = x.shape
    out_dim = params[-1][0].shape[1]

    # bf16 weights for the MXU; biases stay f32 (added on the f32 accumulator).
    flat = []
    for w, b in params:
        flat.append(w.astype(compute_dtype))
        flat.append(b.astype(jnp.float32))

    # --- batch tiling --------------------------------------------------------
    # tb multiple of 16; for any reasonably sized batch use >= 2 blocks so the
    # "parallel" axis can be sharded across v7x's two TensorCores and DMA can
    # overlap compute. Ragged last block is handled by Pallas (no pad/slice).
    if batch < 32:
        tb = batch                                   # block == full dim: always legal
    else:
        tb = min(block_batch, _round_up(pl.cdiv(batch, 2), 16))
    n_blocks = pl.cdiv(batch, tb)

    # --- explicit VMEM budget: real footprint + ~50% headroom, <= 32 MiB -----
    param_bytes = sum(a.size * a.dtype.itemsize for a in flat)
    io_bytes = (2 * tb * in_dim * x.dtype.itemsize                    # dbl-buffered input
                + 2 * tb * out_dim * jnp.dtype(out_dtype).itemsize)   # dbl-buffered output
    interm_bytes = sum(tb * w.shape[1] * 6 for w, _ in params)        # bf16 h + f32 acc
    footprint = param_bytes + io_bytes + interm_bytes
    vmem_limit = int(min(max(int(footprint * 1.5), 4 * 1024 * 1024),
                         32 * 1024 * 1024))

    in_specs = [pl.BlockSpec((tb, in_dim), lambda i: (i, 0))]
    for a in flat:
        # Constant index_map -> param block stays VMEM-resident across steps.
        in_specs.append(pl.BlockSpec(a.shape, lambda i: (0, 0)))

    flops = 2 * batch * sum(w.shape[0] * w.shape[1] for w, _ in params)
    bytes_accessed = (batch * in_dim * x.dtype.itemsize
                      + batch * out_dim * jnp.dtype(out_dtype).itemsize
                      + param_bytes)

    out = pl.pallas_call(
        make_ae_kernel(n_layers, compute_dtype),
        out_shape=jax.ShapeDtypeStruct((batch, out_dim), out_dtype),
        grid=(n_blocks,),
        in_specs=in_specs,
        out_specs=pl.BlockSpec((tb, out_dim), lambda i: (i, 0)),
        compiler_params=pltpu.CompilerParams(
            dimension_semantics=("parallel",),     # megacore sharding on v7x
            vmem_limit_bytes=vmem_limit),
        cost_estimate=pl.CostEstimate(flops=int(flops), transcendentals=0,
                                      bytes_accessed=int(bytes_accessed)),
    )(x, *flat)

    return out


def reference_forward(x, params, compute_dtype=jnp.bfloat16):
    """Pure-JAX reference mirroring the kernel's bf16-operand / f32-accumulate flow."""
    h = x.astype(compute_dtype).astype(jnp.float32)
    for w, b in params:
        wf = w.astype(compute_dtype).astype(jnp.float32)
        h = jnp.maximum(jnp.dot(h, wf, preferred_element_type=jnp.float32)
                        + b.astype(jnp.float32), 0.0)
    return h


if __name__ == "__main__":
    key = jax.random.PRNGKey(0)
    dims = [64, 32, 16]      # Autoencoder(dims=[64, 32, 16]) with default ReLU act
    batch = 200              # not a multiple of the tile -> exercises the ragged tail

    k_x, k_p = jax.random.split(key)
    x = jax.random.normal(k_x, (batch, dims[0]), dtype=jnp.float32)
    params = init_autoencoder_params(k_p, dims)

    # Small demo block so the grid has several steps (cdiv(200,64)=4, last ragged);
    # production default block_batch is 4096.
    out = autoencoder_forward(x, params, block_batch=64)
    out = jax.block_until_ready(out)

    ref = reference_forward(x, params)
    assert out.shape == (batch, dims[0]), out.shape
    assert out.dtype == jnp.bfloat16, out.dtype
    assert jnp.allclose(out.astype(jnp.float32), ref, atol=5e-2, rtol=5e-2), \
        "mismatch vs reference"

    print("KERNEL_OK")
</pallas_src>

<mosaic_0001>
module attributes {stable_mosaic.version = 11 : i64} {
  func.func @kernel(%arg0: i32, %arg1: memref<64x64xf32, #tpu.memory_space<vmem>>, %arg2: memref<64x32xbf16, #tpu.memory_space<vmem>>, %arg3: memref<1x32xf32, #tpu.memory_space<vmem>>, %arg4: memref<32x16xbf16, #tpu.memory_space<vmem>>, %arg5: memref<1x16xf32, #tpu.memory_space<vmem>>, %arg6: memref<16x32xbf16, #tpu.memory_space<vmem>>, %arg7: memref<1x32xf32, #tpu.memory_space<vmem>>, %arg8: memref<32x64xbf16, #tpu.memory_space<vmem>>, %arg9: memref<1x64xf32, #tpu.memory_space<vmem>>, %arg10: memref<64x64xbf16, #tpu.memory_space<vmem>>) attributes {dimension_semantics = [#tpu.dimension_semantics<parallel>], iteration_bounds = array<i64: 4>, scalar_prefetch = 0 : i64, scratch_operands = 0 : i64, tpu.core_type = #tpu.core_type<tc>, window_params = [{transform_indices = @transform_0, window_bounds = array<i64: 64, 64>}, {pipeline_mode = #tpu.pipeline_mode<synchronous>, transform_indices = @transform_1, window_bounds = array<i64: 64, 32>}, {pipeline_mode = #tpu.pipeline_mode<synchronous>, transform_indices = @transform_2, window_bounds = array<i64: 1, 32>}, {pipeline_mode = #tpu.pipeline_mode<synchronous>, transform_indices = @transform_3, window_bounds = array<i64: 32, 16>}, {pipeline_mode = #tpu.pipeline_mode<synchronous>, transform_indices = @transform_4, window_bounds = array<i64: 1, 16>}, {pipeline_mode = #tpu.pipeline_mode<synchronous>, transform_indices = @transform_5, window_bounds = array<i64: 16, 32>}, {pipeline_mode = #tpu.pipeline_mode<synchronous>, transform_indices = @transform_6, window_bounds = array<i64: 1, 32>}, {pipeline_mode = #tpu.pipeline_mode<synchronous>, transform_indices = @transform_7, window_bounds = array<i64: 32, 64>}, {pipeline_mode = #tpu.pipeline_mode<synchronous>, transform_indices = @transform_8, window_bounds = array<i64: 1, 64>}, {transform_indices = @transform_9, window_bounds = array<i64: 64, 64>}]} {
    %c0 = arith.constant 0 : index
    %c0_0 = arith.constant 0 : index
    %0 = vector.load %arg1[%c0, %c0_0] : memref<64x64xf32, #tpu.memory_space<vmem>>, vector<64x64xf32>
    %1 = arith.truncf %0 : vector<64x64xf32> to vector<64x64xbf16>
    %c0_1 = arith.constant 0 : index
    %c0_2 = arith.constant 0 : index
    %2 = vector.load %arg2[%c0_1, %c0_2] : memref<64x32xbf16, #tpu.memory_space<vmem>>, vector<64x32xbf16>
    %c0_3 = arith.constant 0 : index
    %c0_4 = arith.constant 0 : index
    %3 = vector.load %arg3[%c0_3, %c0_4] : memref<1x32xf32, #tpu.memory_space<vmem>>, vector<1x32xf32>
    %cst = arith.constant dense<0.000000e+00> : vector<64x32xf32>
    %4 = tpu.matmul %1, %2, %cst {dimension_numbers = #tpu.dot_dimension_numbers<[1], [0], [0], [1], [0, 0, 1, 1], [], []>} : vector<64x64xbf16>, vector<64x32xbf16>, vector<64x32xf32> -> vector<64x32xf32>
    %5 = vector.broadcast %3 : vector<1x32xf32> to vector<64x32xf32>
    %6 = arith.addf %4, %5 : vector<64x32xf32>
    %cst_5 = arith.constant 0.000000e+00 : f32
    %7 = vector.broadcast %cst_5 : f32 to vector<64x32xf32>
    %8 = arith.maximumf %6, %7 : vector<64x32xf32>
    %9 = arith.truncf %8 : vector<64x32xf32> to vector<64x32xbf16>
    %c0_6 = arith.constant 0 : index
    %c0_7 = arith.constant 0 : index
    %10 = vector.load %arg4[%c0_6, %c0_7] : memref<32x16xbf16, #tpu.memory_space<vmem>>, vector<32x16xbf16>
    %c0_8 = arith.constant 0 : index
    %c0_9 = arith.constant 0 : index
    %11 = vector.load %arg5[%c0_8, %c0_9] : memref<1x16xf32, #tpu.memory_space<vmem>>, vector<1x16xf32>
    %cst_10 = arith.constant dense<0.000000e+00> : vector<64x16xf32>
    %12 = tpu.matmul %9, %10, %cst_10 {dimension_numbers = #tpu.dot_dimension_numbers<[1], [0], [0], [1], [0, 0, 1, 1], [], []>} : vector<64x32xbf16>, vector<32x16xbf16>, vector<64x16xf32> -> vector<64x16xf32>
    %13 = vector.broadcast %11 : vector<1x16xf32> to vector<64x16xf32>
    %14 = arith.addf %12, %13 : vector<64x16xf32>
    %cst_11 = arith.constant 0.000000e+00 : f32
    %15 = vector.broadcast %cst_11 : f32 to vector<64x16xf32>
    %16 = arith.maximumf %14, %15 : vector<64x16xf32>
    %17 = arith.truncf %16 : vector<64x16xf32> to vector<64x16xbf16>
    %c0_12 = arith.constant 0 : index
    %c0_13 = arith.constant 0 : index
    %18 = vector.load %arg6[%c0_12, %c0_13] : memref<16x32xbf16, #tpu.memory_space<vmem>>, vector<16x32xbf16>
    %c0_14 = arith.constant 0 : index
    %c0_15 = arith.constant 0 : index
    %19 = vector.load %arg7[%c0_14, %c0_15] : memref<1x32xf32, #tpu.memory_space<vmem>>, vector<1x32xf32>
    %cst_16 = arith.constant dense<0.000000e+00> : vector<64x32xf32>
    %20 = tpu.matmul %17, %18, %cst_16 {dimension_numbers = #tpu.dot_dimension_numbers<[1], [0], [0], [1], [0, 0, 1, 1], [], []>} : vector<64x16xbf16>, vector<16x32xbf16>, vector<64x32xf32> -> vector<64x32xf32>
    %21 = vector.broadcast %19 : vector<1x32xf32> to vector<64x32xf32>
    %22 = arith.addf %20, %21 : vector<64x32xf32>
    %cst_17 = arith.constant 0.000000e+00 : f32
    %23 = vector.broadcast %cst_17 : f32 to vector<64x32xf32>
    %24 = arith.maximumf %22, %23 : vector<64x32xf32>
    %25 = arith.truncf %24 : vector<64x32xf32> to vector<64x32xbf16>
    %c0_18 = arith.constant 0 : index
    %c0_19 = arith.constant 0 : index
    %26 = vector.load %arg8[%c0_18, %c0_19] : memref<32x64xbf16, #tpu.memory_space<vmem>>, vector<32x64xbf16>
    %c0_20 = arith.constant 0 : index
    %c0_21 = arith.constant 0 : index
    %27 = vector.load %arg9[%c0_20, %c0_21] : memref<1x64xf32, #tpu.memory_space<vmem>>, vector<1x64xf32>
    %cst_22 = arith.constant dense<0.000000e+00> : vector<64x64xf32>
    %28 = tpu.matmul %25, %26, %cst_22 {dimension_numbers = #tpu.dot_dimension_numbers<[1], [0], [0], [1], [0, 0, 1, 1], [], []>} : vector<64x32xbf16>, vector<32x64xbf16>, vector<64x64xf32> -> vector<64x64xf32>
    %29 = vector.broadcast %27 : vector<1x64xf32> to vector<64x64xf32>
    %30 = arith.addf %28, %29 : vector<64x64xf32>
    %cst_23 = arith.constant 0.000000e+00 : f32
    %31 = vector.broadcast %cst_23 : f32 to vector<64x64xf32>
    %32 = arith.maximumf %30, %31 : vector<64x64xf32>
    %33 = arith.truncf %32 : vector<64x64xf32> to vector<64x64xbf16>
    %c0_24 = arith.constant 0 : index
    %c0_25 = arith.constant 0 : index
    %34 = vector.load %arg10[%c0_24, %c0_25] : memref<64x64xbf16, #tpu.memory_space<vmem>>, vector<64x64xbf16>
    tpu.vector_store %arg10[%c0_24, %c0_25], %33 {strides = array<i32>} : memref<64x64xbf16, #tpu.memory_space<vmem>>, vector<64x64xbf16>,
    return
  }
  func.func @transform_0(%arg0: i32) -> (i32, i32) {
    %c0_i32 = arith.constant 0 : i32
    %c0_i32_0 = arith.constant 0 : i32
    return %arg0, %c0_i32 : i32, i32
  }
  func.func @transform_1(%arg0: i32) -> (i32, i32) {
    %c0_i32 = arith.constant 0 : i32
    %c0_i32_0 = arith.constant 0 : i32
    %c0_i32_1 = arith.constant 0 : i32
    return %c0_i32, %c0_i32_0 : i32, i32
  }
  func.func @transform_2(%arg0: i32) -> (i32, i32) {
    %c0_i32 = arith.constant 0 : i32
    %c0_i32_0 = arith.constant 0 : i32
    %c0_i32_1 = arith.constant 0 : i32
    return %c0_i32, %c0_i32_0 : i32, i32
  }
  func.func @transform_3(%arg0: i32) -> (i32, i32) {
    %c0_i32 = arith.constant 0 : i32
    %c0_i32_0 = arith.constant 0 : i32
    %c0_i32_1 = arith.constant 0 : i32
    return %c0_i32, %c0_i32_0 : i32, i32
  }
  func.func @transform_4(%arg0: i32) -> (i32, i32) {
    %c0_i32 = arith.constant 0 : i32
    %c0_i32_0 = arith.constant 0 : i32
    %c0_i32_1 = arith.constant 0 : i32
    return %c0_i32, %c0_i32_0 : i32, i32
  }
  func.func @transform_5(%arg0: i32) -> (i32, i32) {
    %c0_i32 = arith.constant 0 : i32
    %c0_i32_0 = arith.constant 0 : i32
    %c0_i32_1 = arith.constant 0 : i32
    return %c0_i32, %c0_i32_0 : i32, i32
  }
  func.func @transform_6(%arg0: i32) -> (i32, i32) {
    %c0_i32 = arith.constant 0 : i32
    %c0_i32_0 = arith.constant 0 : i32
    %c0_i32_1 = arith.constant 0 : i32
    return %c0_i32, %c0_i32_0 : i32, i32
  }
  func.func @transform_7(%arg0: i32) -> (i32, i32) {
    %c0_i32 = arith.constant 0 : i32
    %c0_i32_0 = arith.constant 0 : i32
    %c0_i32_1 = arith.constant 0 : i32
    return %c0_i32, %c0_i32_0 : i32, i32
  }
  func.func @transform_8(%arg0: i32) -> (i32, i32) {
    %c0_i32 = arith.constant 0 : i32
    %c0_i32_0 = arith.constant 0 : i32
    %c0_i32_1 = arith.constant 0 : i32
    return %c0_i32, %c0_i32_0 : i32, i32
  }
  func.func @transform_9(%arg0: i32) -> (i32, i32) {
    %c0_i32 = arith.constant 0 : i32
    %c0_i32_0 = arith.constant 0 : i32
    return %arg0, %c0_i32 : i32, i32
  }
}

</mosaic_0001>

<bundles_post_ra>
// kernel: tpu_custom_call.1
= control target key start
LH: loop header
LB: loop body
LE: loop exit
PB: predicated region body
PF: predicated region fallthrough
CT: control target
= control target key end

     0   :  { %s1487_s30 = smov 0   ;;  %s1489_s10 = smov 0   ;;  %s1659_s0 = inlined_call_operand.vmem [shape: f32[200,64], index: 0, kind: input, shape index: {}]   ;;  %s1660_s1 = inlined_call_operand.vmem [shape: bf16[64,32], index: 1, kind: input, shape index: {}]   ;;  %s1661_s2 = inlined_call_operand.vmem [shape: f32[1,32], index: 2, kind: input, shape index: {}]   ;;  %s1662_s3 = inlined_call_operand.vmem [shape: bf16[32,16], index: 3, kind: input, shape index: {}]   ;;  %s1663_s4 = inlined_call_operand.vmem [shape: f32[1,16], index: 4, kind: input, shape index: {}]   ;;  %s1664_s5 = inlined_call_operand.vmem [shape: bf16[16,32], index: 5, kind: input, shape index: {}]   ;;  %s1665_s6 = inlined_call_operand.vmem [shape: f32[1,32], index: 6, kind: input, shape index: {}]   ;;  %s1666_s7 = inlined_call_operand.vmem [shape: bf16[32,64], index: 7, kind: input, shape index: {}]   ;;  %s1667_s8 = inlined_call_operand.vmem [shape: f32[1,64], index: 8, kind: input, shape index: {}]   ;;  %s1668_s9 = inlined_call_operand.vmem [shape: bf16[200,64], index: 9, kind: output, shape index: {}]  }
   0x1   :  { %s1491_s11 = smov 0  }
   0x2 LB: > { %s1500_s12 = sadd.s32 4294967295, %s1403_s11   ;;  %s1502_s13 = sadd.s32 1, %s1403_s11   ;;  %s1403_s11 = sphi %s1491_s11, %s1675_s11   ;;  %s1399_s10 = sphi %s1489_s10, %s1674_s10   ;;  %s1395_s30 = sphi %s1487_s30, %s1673_s30  }
   0x3   : > { %s217_s14 = ssub.s32 %s1403_s11, %s1502_s13  ;;  %s220_s15 = sadd.s32 1, %s1399_s10 }
   0x4   : > { %p218_p0 = scmp.eq.s32.totalorder %s217_s14, 0  ;;  %p230_p1 = scmp.ne.s32.totalorder %s1399_s10, %s1395_s30 }
   0x5   : > { %p231_p2 = scmp.eq.s32.totalorder %s1500_s12, 3  ;;  %p1108_p3 = scmp.ge.s32.totalorder %s1403_s11, 1 }
   0x6   : > { %s1510_s16 = scalar_select %p218_p0, %s1399_s10, %s220_s15  }
   0x7   : > { %p1512_p4 = por %p231_p2, %p230_p1  ;;  %p296_p5 = scmp.lt.s32.totalorder %s1403_s11, 5 }
   0x9   : > { %p297_p6 = pnand %p1108_p3, %p296_p5 }
   0xa   : > { %v1340_v0 = vld [vmem:[%s1660_s1] sm:$0xff] (!%p297_p6)   ;;  %s1520_s20 = sshll.u32 (!%p297_p6), %s1500_s12, 3  ;;  %v1341_v1 = vld [vmem:[%s1660_s1 + $0x8] sm:$0xff] (!%p297_p6)   ;;  %v1342_v2 = vld [vmem:[%s1660_s1 + $0x10] sm:$0xff] (!%p297_p6)   ;;  %vm406_vm0 = vcmask (!%p297_p6), 523264   ;;  %vm519_vm1 = vcmask (!%p297_p6), 261120  }
   0xb   : > { %300 = sbr.rel (%p297_p6) target bundleno = 977 (0x3d1), region = 56  ;;  %p340_p7 = scmp.lt.s32.totalorder (!%p297_p6), %s1520_s20, 24  ;;  %1202 = vmatprep.subr.bf16.mxu0 (!%p297_p6), %v1340_v0  ;;  %v1343_v5 = vld [vmem:[%s1660_s1 + $0x18] sm:$0xff] (!%p297_p6)   ;;  %v1344_v16 = vld [vmem:[%s1662_s3] sm:$0xff] (!%p297_p6)   ;;  %v1345_v17 = vld [vmem:[%s1662_s3 + $0x8] sm:$0xff] (!%p297_p6)   ;;  %vm624_vm2 = vcmask (!%p297_p6), 130048  }
   0xc   : > { %1203 = vmatpush3.bf16.msra.mxu0 (!%p297_p6), %v1340_v0  ;;  %1218 = vmatprep.subr.bf16.mxu1 (!%p297_p6), %v1344_v16  ;;  %v1346_v18 = vld [vmem:[%s1664_s5] sm:$0xff] (!%p297_p6)   ;;  %s332_s19 = sand.u32 (!%p297_p6), 1, %s1395_s30   ;;  %vm854_vm3 = vcmask (!%p297_p6), 519168  }
   0xd   : > { %1204 = vmatprep.subr.bf16.mxu0 (!%p297_p6), %v1341_v1  ;;  %1219 = vmatpush3.bf16.msra.mxu1 (!%p297_p6), %v1344_v16  ;;  %v1112_v19 = vld [vmem:[%s1661_s2] ss:$0 sm:$0xff] (!%p297_p6)  ;;  %s1109_s23 = sshll.u32 (!%p297_p6), %s332_s19, 5 }
   0xe   : > { %1220 = vmatprep.subr.bf16.mxu1 (!%p297_p6), %v1345_v17  ;;  %v1347_v48 = vld [vmem:[%s1666_s7] sm:$0xff] (!%p297_p6)   ;;  %s1580_s30 = scalar_lea.vmem (!%p297_p6), [#allocation2], %s1109_s23  }
   0xf   : > { %v1121_v49 = vld [vmem:[%s1663_s4] ss:$0 sm:$0xff] (!%p297_p6) }
  0x10   : > { %1205 = vmatpush3.bf16.msra.mxu0 (!%p297_p6), %v1341_v1 }
  0x11   : > { %1206 = vmatprep.subr.bf16.mxu0 (!%p297_p6), %v1342_v2  ;;  %1221 = vmatpush3.bf16.msra.mxu1 (!%p297_p6), %v1345_v17 }
  0x12   : > { %s341_s25 = scalar_select %p340_p7, %s1520_s20, 24  ;;  %1230 = vmatprep.subr.bf16.mxu1 %v1346_v18 }
  0x13   : > { %s871_s24 = ssub.s32 (%p1512_p4), 25, %s1520_s20 }
  0x14   : > { %s1111_s26 = sshll.u32 %s341_s25, 3  ;;  %1207 = vmatpush3.bf16.msra.mxu0 %v1342_v2  ;;  %s1174_s25 = sshll.u32 (%p1512_p4), %s1500_s12, 5 }
  0x15   : > { %s343_s29 = scalar_lea.vmem %s1659_s0, %s1111_s26  ;;  %1208 = vmatprep.subr.bf16.mxu0 %v1343_v5  ;;  %p872_p8 = scmp.lt.s32.totalorder (%p1512_p4), %s871_s24, 8 }
  0x16   : > { %v355_v3 = vld [vmem:[%s343_s29] sm:$0xff]  ;;  %v356_v4 = vld [vmem:[%s343_s29 + $0x8] sm:$0xff]  ;;  %v357_v7 = vld [vmem:[%s343_s29 + $0x10] sm:$0xff]  ;;  %s1605_s28 = scalar_lea.vmem (%p1512_p4), %s1668_s9, %s1174_s25  }
  0x17   : > { %v363_v6 = vpack.c.bf16 %v356_v4, %v355_v3  ;;  %v358_v8 = vld [vmem:[%s343_s29 + $0x18] sm:$0xff]  ;;  %v359_v9 = vld [vmem:[%s343_s29 + $0x20] sm:$0xff]  ;;  %v360_v10 = vld [vmem:[%s343_s29 + $0x28] sm:$0xff] }
  0x18   : > { %v364_v11 = vpack.c.bf16 %v358_v8, %v357_v7  ;;  %1209 = vmatpush3.bf16.msra.mxu0 %v1343_v5  ;;  %v365_v12 = vpack.c.bf16 %v360_v10, %v359_v9  ;;  %v361_v13 = vld [vmem:[%s343_s29 + $0x30] sm:$0xff]  ;;  %v362_v14 = vld [vmem:[%s343_s29 + $0x38] sm:$0xff] }
  0x19   : > { %1210 = vmatprep.mubr.msk.bf16.mxu0 %vm406_vm0, %v363_v6  ;;  %v366_v15 = vpack.c.bf16 %v362_v14, %v361_v13  ;;  %1240 = vmatprep.subr.bf16.mxu0 %v1347_v48  ;;  %v1348_v14 = vld [vmem:[%s1666_s7 + $0x8] sm:$0xff]  }
  0x1b   : > { %1211 = vmatmul.mubr.msk.bf16.vlgmr.msra.gmra.mrb[0].mxu0 %vm406_vm0, %v364_v11 }
  0x1c   : > { %1214 = vmatprep.mubr.msk.bf16.mxu0 %vm406_vm0, %v365_v12  ;;  %1241 = vmatpush3.bf16.msra.mxu0 %v1347_v48 }
  0x1d   : > { %1242 = vmatprep.subr.bf16.mxu0 %v1348_v14 }
  0x20   : > { %1243 = vmatpush3.bf16.msra.mxu0 %v1348_v14 }
  0x23   : > { %1215 = vmatmul.mubr.msk.bf16.gmra.mrb[4].mxu0 %vm406_vm0, %v366_v15  ;;  %v1128_v15 = vld [vmem:[%s1665_s6] ss:$0 sm:$0xff] }
  0xee   : > { %v1212_v20 = vpop.f32.mrb[0].mxu0 }
  0xef   : > { %v462_v21 = vadd.f32 %v1212_v20, %v1112_v19  ;;  %v453_v22 = vpop.f32.mrb[1].mxu0 }
  0xf0   : > { %v454_v23 = vadd.f32 %v1112_v19, %v453_v22  ;;  %v1213_v24 = vpop.f32.mrb[2].mxu0 }
  0xf1   : > { %v465_v25 = vadd.f32 %v1213_v24, %v1112_v19  ;;  %v456_v26 = vpop.f32.mrb[3].mxu0  ;;  %v486_v28 = vmax.f32 %v462_v21, 0.0 }
  0xf2   : > { %v457_v27 = vadd.f32 %v1112_v19, %v456_v26  ;;  %v484_v30 = vmax.f32 %v454_v23, 0.0 }
  0xf3   : > { %v487_v29 = vmax.f32 %v465_v25, 0.0 }
  0xf4   : > { %v485_v31 = vmax.f32 %v457_v27, 0.0 }
  0xf5   : > { %v493_v32 = vpack.c.bf16 %v487_v29, %v486_v28 }
  0xf6   : > { %v1216_v33 = vpop.f32.mrb[4].mxu0  ;;  %v492_v34 = vpack.c.bf16 %v485_v31, %v484_v30 }
  0xf7   : > { %v478_v35 = vadd.f32 %v1216_v33, %v1112_v19  ;;  %v469_v36 = vpop.f32.mrb[5].mxu0 }
  0xf8   : > { %v470_v37 = vadd.f32 %v1112_v19, %v469_v36  ;;  %v1217_v38 = vpop.f32.mrb[6].mxu0  ;;  %1222 = vmatprep.mubr.msk.bf16.mxu1 %vm519_vm1, %v492_v34 }
  0xf9   : > { %v481_v39 = vadd.f32 %v1217_v38, %v1112_v19  ;;  %v472_v40 = vpop.f32.mrb[7].mxu0  ;;  %1223 = vmatmul.mubr.msk.bf16.vlgmr.msra.gmra.mrb[0].mxu1 %vm519_vm1, %v493_v32  ;;  %v490_v42 = vmax.f32 %v478_v35, 0.0 }
  0xfa   : > { %v473_v41 = vadd.f32 %v1112_v19, %v472_v40  ;;  %1231 = vmatpush3.bf16.msra.mxu1 %v1346_v18  ;;  %v488_v44 = vmax.f32 %v470_v37, 0.0 }
  0xfb   : > { %v491_v43 = vmax.f32 %v481_v39, 0.0 }
  0xfc   : > { %v489_v45 = vmax.f32 %v473_v41, 0.0 }
  0xfd   : > { %v495_v46 = vpack.c.bf16 %v491_v43, %v490_v42 }
  0xfe   : > { %v494_v47 = vpack.c.bf16 %v489_v45, %v488_v44  ;;  %v1134_v44 = vld [vmem:[%s1667_s8] ss:$0 sm:$0xff] }
 0x100   : > { %1226 = vmatprep.mubr.msk.bf16.mxu1 %vm519_vm1, %v494_v47 }
 0x101   : > { %1227 = vmatmul.mubr.msk.bf16.gmra.mrb[4].mxu1 %vm519_vm1, %v495_v46 }
 0x1cc   : > { %v1224_v50 = vpop.f32.mrb[0].mxu1 }
 0x1cd   : > { %v575_v51 = vadd.f32 %v1224_v50, %v1121_v49  ;;  %v566_v52 = vpop.f32.mrb[1].mxu1 }
 0x1ce   : > { %v567_v53 = vadd.f32 %v1121_v49, %v566_v52  ;;  %v1225_v54 = vpop.f32.mrb[2].mxu1 }
 0x1cf   : > { %v578_v55 = vadd.f32 %v1225_v54, %v1121_v49  ;;  %v569_v56 = vpop.f32.mrb[3].mxu1  ;;  %v599_v58 = vmax.f32 %v575_v51, 0.0 }
 0x1d0   : > { %v570_v57 = vadd.f32 %v1121_v49, %v569_v56  ;;  %v597_v60 = vmax.f32 %v567_v53, 0.0 }
 0x1d1   : > { %v600_v59 = vmax.f32 %v578_v55, 0.0 }
 0x1d2   : > { %v598_v61 = vmax.f32 %v570_v57, 0.0 }
 0x1d3   : > { %v606_v62 = vpack.c.bf16 %v600_v59, %v599_v58 }
 0x1d4   : > { %v605_v63 = vpack.c.bf16 %v598_v61, %v597_v60  ;;  %v1228_v0 = vpop.f32.mrb[4].mxu1 }
 0x1d5   : > { %v591_v1 = vadd.f32 %v1228_v0, %v1121_v49  ;;  %v582_v2 = vpop.f32.mrb[5].mxu1 }
 0x1d6   : > { %v583_v3 = vadd.f32 %v1121_v49, %v582_v2  ;;  %v1229_v4 = vpop.f32.mrb[6].mxu1  ;;  %1232 = vmatprep.mubr.msk.bf16.mxu1 %vm624_vm2, %v605_v63 }
 0x1d7   : > { %v594_v5 = vadd.f32 %v1229_v4, %v1121_v49  ;;  %v585_v6 = vpop.f32.mrb[7].mxu1  ;;  %1233 = vmatmul.mubr.msk.bf16.vlgmr.msra.gmra.mrb[8].mxu1 %vm624_vm2, %v606_v62  ;;  %v603_v8 = vmax.f32 %v591_v1, 0.0 }
 0x1d8   : > { %v586_v7 = vadd.f32 %v1121_v49, %v585_v6  ;;  %v601_v10 = vmax.f32 %v583_v3, 0.0 }
 0x1d9   : > { %v604_v9 = vmax.f32 %v594_v5, 0.0 }
 0x1da   : > { %v602_v11 = vmax.f32 %v586_v7, 0.0 }
 0x1db   : > { %v608_v12 = vpack.c.bf16 %v604_v9, %v603_v8 }
 0x1dc   : > { %v607_v13 = vpack.c.bf16 %v602_v11, %v601_v10 }
 0x1de   : > { %1236 = vmatprep.mubr.msk.bf16.mxu1 %vm624_vm2, %v607_v13 }
 0x1df   : > { %1237 = vmatmul.mubr.msk.bf16.gmra.mrb[12].mxu1 %vm624_vm2, %v608_v12 }
 0x2aa   : > { %v1234_v16 = vpop.f32.mrb[8].mxu1 }
 0x2ab   : > { %v680_v17 = vadd.f32 %v1234_v16, %v1128_v15  ;;  %v671_v18 = vpop.f32.mrb[9].mxu1 }
 0x2ac   : > { %v672_v19 = vadd.f32 %v1128_v15, %v671_v18  ;;  %v1235_v20 = vpop.f32.mrb[10].mxu1 }
 0x2ad   : > { %v683_v21 = vadd.f32 %v1235_v20, %v1128_v15  ;;  %v674_v22 = vpop.f32.mrb[11].mxu1  ;;  %v704_v24 = vmax.f32 %v680_v17, 0.0 }
 0x2ae   : > { %v675_v23 = vadd.f32 %v1128_v15, %v674_v22  ;;  %v702_v26 = vmax.f32 %v672_v19, 0.0 }
 0x2af   : > { %v705_v25 = vmax.f32 %v683_v21, 0.0 }
 0x2b0   : > { %v703_v27 = vmax.f32 %v675_v23, 0.0 }
 0x2b1   : > { %v711_v28 = vpack.c.bf16 %v705_v25, %v704_v24 }
 0x2b2   : > { %v710_v29 = vpack.c.bf16 %v703_v27, %v702_v26  ;;  %v1238_v30 = vpop.f32.mrb[12].mxu1 }
 0x2b3   : > { %v696_v31 = vadd.f32 %v1238_v30, %v1128_v15  ;;  %v687_v32 = vpop.f32.mrb[13].mxu1 }
 0x2b4   : > { %v688_v33 = vadd.f32 %v1128_v15, %v687_v32  ;;  %v1239_v34 = vpop.f32.mrb[14].mxu1  ;;  %1244 = vmatprep.mubr.msk.bf16.mxu0 %vm519_vm1, %v710_v29 }
 0x2b5   : > { %v699_v35 = vadd.f32 %v1239_v34, %v1128_v15  ;;  %v690_v36 = vpop.f32.mrb[15].mxu1  ;;  %1245 = vmatmul.mubr.msk.bf16.vlgmr.msra.gmra.mrb[8].mxu0 %vm519_vm1, %v711_v28  ;;  %v708_v38 = vmax.f32 %v696_v31, 0.0 }
 0x2b6   : > { %v691_v37 = vadd.f32 %v1128_v15, %v690_v36  ;;  %v706_v40 = vmax.f32 %v688_v33, 0.0 }
 0x2b7   : > { %v709_v39 = vmax.f32 %v699_v35, 0.0 }
 0x2b8   : > { %v707_v41 = vmax.f32 %v691_v37, 0.0 }
 0x2b9   : > { %v713_v42 = vpack.c.bf16 %v709_v39, %v708_v38 }
 0x2ba   : > { %v712_v43 = vpack.c.bf16 %v707_v41, %v706_v40 }
 0x2bc   : > { %1248 = vmatprep.mubr.msk.bf16.mxu0 %vm519_vm1, %v712_v43 }
 0x2bd   : > { %1249 = vmatmul.mubr.msk.bf16.gmra.mrb[12].mxu0 %vm519_vm1, %v713_v42 }
 0x388   : > { %v1246_v45 = vpop.f32.mrb[8].mxu0 }
 0x389   : > { %v792_v46 = vadd.f32 %v1246_v45, %v1134_v44  ;;  %v783_v47 = vpop.f32.mrb[9].mxu0 }
 0x38a   : > { %v784_v48 = vadd.f32 %v1134_v44, %v783_v47  ;;  %v1247_v49 = vpop.f32.mrb[10].mxu0 }
 0x38b   : > { %v816_v50 = vmax.f32 %v792_v46, 0.0  ;;  %v795_v51 = vadd.f32 %v1247_v49, %v1134_v44  ;;  %v786_v52 = vpop.f32.mrb[11].mxu0 }
 0x38c   : > { %v814_v53 = vmax.f32 %v784_v48, 0.0  ;;  %v787_v54 = vadd.f32 %v1134_v44, %v786_v52 }
 0x38d   : > { %v1168_v55 = vpack.c.bf16 %v816_v50, %v816_v50  ;;  %v817_v56 = vmax.f32 %v795_v51, 0.0 }
 0x38e   : > { %v1166_v57 = vpack.c.bf16 %v814_v53, %v814_v53  ;;  %v815_v58 = vmax.f32 %v787_v54, 0.0 }
 0x38f   : > { %857 = vst.msk [vmem:[%s1580_s30 + $0x8] sm:$0xf] %vm854_vm3, %v1168_v55  ;;  %v1169_v59 = vpack.c.bf16 %v817_v56, %v817_v56 }
 0x390   : > { %855 = vst.msk [vmem:[%s1580_s30] sm:$0xf] %vm854_vm3, %v1166_v57  ;;  %v1167_v60 = vpack.c.bf16 %v815_v58, %v815_v58  ;;  %v1250_v61 = vpop.f32.mrb[12].mxu0 }
 0x391   : > { %858 = vst.msk [vmem:[%s1580_s30 + $0xc] sm:$0xf] %vm854_vm3, %v1169_v59  ;;  %v808_v62 = vadd.f32 %v1250_v61, %v1134_v44  ;;  %v799_v63 = vpop.f32.mrb[13].mxu0 }
 0x392   : > { %856 = vst.msk [vmem:[%s1580_s30 + $0x4] sm:$0xf] %vm854_vm3, %v1167_v60  ;;  %v800_v0 = vadd.f32 %v1134_v44, %v799_v63  ;;  %v1251_v1 = vpop.f32.mrb[14].mxu0 }
 0x393   : > { %v820_v2 = vmax.f32 %v808_v62, 0.0  ;;  %v811_v3 = vadd.f32 %v1251_v1, %v1134_v44  ;;  %v802_v4 = vpop.f32.mrb[15].mxu0 }
 0x394   : > { %v818_v5 = vmax.f32 %v800_v0, 0.0  ;;  %v803_v6 = vadd.f32 %v1134_v44, %v802_v4  ;;  %869 = sbr.rel (!%p1512_p4) target bundleno = 977 (0x3d1), region = 60 }
 0x395   : > { %v1172_v7 = vpack.c.bf16 %v820_v2, %v820_v2  ;;  %v821_v8 = vmax.f32 %v811_v3, 0.0 }
 0x396   : > { %v1170_v9 = vpack.c.bf16 %v818_v5, %v818_v5  ;;  %v819_v10 = vmax.f32 %v803_v6, 0.0 }
 0x397   : > { %861 = vst.msk [vmem:[%s1580_s30 + $0x18] sm:$0xf] %vm854_vm3, %v1172_v7  ;;  %v1173_v11 = vpack.c.bf16 %v821_v8, %v821_v8 }
 0x398   : > { %859 = vst.msk [vmem:[%s1580_s30 + $0x10] sm:$0xf] %vm854_vm3, %v1170_v9  ;;  %v1171_v12 = vpack.c.bf16 %v819_v10, %v819_v10 }
 0x399   : > { %862 = vst.msk [vmem:[%s1580_s30 + $0x1c] sm:$0xf] %vm854_vm3, %v1173_v11 }
 0x39a   : > { %860 = vst.msk [vmem:[%s1580_s30 + $0x14] sm:$0xf] %vm854_vm3, %v1171_v12 }
 0x39b   : > { %s1677_s24 = smov (!%p872_p8, %s871_s24), 8 }
 0x39c   : > { %s1151_s29 = sshll.u32 %s1677_s24, 6 }
 0x39d   : > { %p1154_p9 = scmp.eq.s32.totalorder %s1151_s29, 0 }
 0x39e   : > { %s1611_s11 = sshrl.u32 (!%p1154_p9), %s1677_s24, 3 }
 0x39f   : > { %880 = sbr.rel (%p1154_p9) target bundleno = 977 (0x3d1), region = 64  ;;  %p1155_p10 = scmp.le.s32.totalorder (!%p1154_p9), %s1611_s11, 0 }
 0x3a6   : > { %1061 = sbr.rel (%p1155_p10) target bundleno = 956 (0x3bc), region = 136  ;;  %s1670_s12 = smov (!%p1155_p10), %s1605_s28 }
 0x3a7   : > { %s1671_s17 = smov (!%p1155_p10), %s1580_s30  ;;  %s1620_s20 = smov (!%p1155_p10), 0  }
 0x3a8   : > { %s1622_s14 = smov (!%p1155_p10), 0  }
 0x3ad LB: >> { %v896_v13 = vld [vmem:[%s1411_s17] sm:$0xf]  ;;  %v898_v14 = vld [vmem:[%s1411_s17 + $0x4] sm:$0xf]  ;;  %v900_v15 = vld [vmem:[%s1411_s17 + $0x8] sm:$0xf]  ;;  %s1419_s14 = sphi %s1622_s14, %s890_s14   ;;  %s1415_s20 = sphi %s1620_s20, %s1672_s20   ;;  %s1411_s17 = sphi %s1671_s17, %s917_s17   ;;  %s1407_s12 = sphi %s1670_s12, %s918_s12  }
 0x3ae   : >> { %897 = vst [vmem:[%s1407_s12] sm:$0xf] %v896_v13  ;;  %899 = vst [vmem:[%s1407_s12 + $0x4] sm:$0xf] %v898_v14  ;;  %v902_v16 = vld [vmem:[%s1411_s17 + $0xc] sm:$0xf]  ;;  %s912_s15 = sadd.s32 1, %s1415_s20 }
 0x3af   : >> { %901 = vst [vmem:[%s1407_s12 + $0x8] sm:$0xf] %v900_v15  ;;  %v904_v17 = vld [vmem:[%s1411_s17 + $0x10] sm:$0xf]  ;;  %v906_v18 = vld [vmem:[%s1411_s17 + $0x14] sm:$0xf]  ;;  %p913_p11 = scmp.ge.s32.totalorder %s912_s15, %s1611_s11 }
 0x3b0   : >> { %903 = vst [vmem:[%s1407_s12 + $0xc] sm:$0xf] %v902_v16  ;;  %905 = vst [vmem:[%s1407_s12 + $0x10] sm:$0xf] %v904_v17  ;;  %v908_v19 = vld [vmem:[%s1411_s17 + $0x18] sm:$0xf] }
 0x3b1   : >> { %907 = vst [vmem:[%s1407_s12 + $0x14] sm:$0xf] %v906_v18  ;;  %v910_v20 = vld [vmem:[%s1411_s17 + $0x1c] sm:$0xf]  ;;  %909 = vst [vmem:[%s1407_s12 + $0x18] sm:$0xf] %v908_v19 }
 0x3b2   : >> { %911 = vst [vmem:[%s1407_s12 + $0x1c] sm:$0xf] %v910_v20  ;;  %s1679_s15 = smov (%p913_p11, %s912_s15), 0  ;;  %s890_s14 = sadd.s32 1, %s1419_s14  }
 0x3b3   : >> { %s1156_s18 = sshll.u32 %s1679_s15, 5  ;;  %p889_p12 = scmp.ge.s32.totalorder %s890_s14, %s1611_s11 }
 0x3b4   : >> { %s917_s17 = scalar_lea.vmem %s1580_s30, %s1156_s18 [#allocation2]   ;;  %s918_s12 = scalar_lea.vmem %s1605_s28, %s1156_s18  }
 0x3b5   : >> { %s1672_s20 = smov %s1679_s15  ;;  %892 = sbr.rel (!%p889_p12) target bundleno = 941 (0x3ad), region = 142 }
 0x3bc PF: > { %s1641_s19 = sand.u32 7, %s1677_s24   ;;  %s1175_s21 = sshll.u32 %s1611_s11, 5 }
 0x3bd   : > { %s923_s22 = scalar_lea.vmem %s1580_s30, %s1175_s21 [#allocation2]   ;;  %s925_s23 = scalar_lea.vmem %s1605_s28, %s1175_s21  }
 0x3be   : > { %p1161_p13 = scmp.le.s32.totalorder %s1641_s19, 0 }
 0x3bf   : > { %s1421_s25 = smov (!%p1161_p13), %s925_s23   ;;  %s1425_s26 = smov (!%p1161_p13), %s923_s22  }
 0x3c0   : > { %1075 = sbr.rel (%p1161_p13) target bundleno = 977 (0x3d1), region = 147  ;;  %s1429_s27 = smov (!%p1161_p13), 0  }
 0x3c1   : > { %s1433_s29 = smov (!%p1161_p13), 0  }
 0x3c7 LB: >> { %v935_v21 = vld [vmem:[%s1427_s26] sm:$0xf]  ;;  %s937_s24 = sadd.s32 1, %s1431_s27  ;;  %s929_s29 = sadd.s32 1, %s1435_s29   ;;  %s1435_s29 = sphi %s1433_s29, %s929_s29   ;;  %s1431_s27 = sphi %s1429_s27, %s1430_s27   ;;  %s1427_s26 = sphi %s1425_s26, %s942_s26   ;;  %s1423_s25 = sphi %s1421_s25, %s943_s25  }
 0x3c8   : >> { %936 = vst [vmem:[%s1423_s25] sm:$0xf] %v935_v21  ;;  %p938_p0 = scmp.ge.s32.totalorder %s937_s24, %s1641_s19  ;;  %p928_p1 = scmp.ge.s32.totalorder %s929_s29, %s1641_s19 }
 0x3ca   : >> { %s1681_s24 = smov (%p938_p0, %s937_s24), 0  ;;  %931 = sbr.rel (!%p928_p1) target bundleno = 967 (0x3c7), region = 153 }
 0x3cb   : >> { %s1162_s30 = sshll.u32 %s1681_s24, 2  ;;  %s1430_s27 = smov %s1681_s24  }
 0x3cc   : >> { %s942_s26 = scalar_lea.vmem %s923_s22, %s1162_s30 [#allocation2]   ;;  %s943_s25 = scalar_lea.vmem %s925_s23, %s1162_s30  }
 0x3d1 PF: > { %p16_p2 = scmp.ge.s32.totalorder %s1502_s13, 6   ;;  %s1673_s30 = smov %s1399_s10 }
 0x3d2   : > { %s1674_s10 = smov %s1510_s16  ;;  %s1675_s11 = smov %s1502_s13 }
 0x3d3   :  { %18 = sbr.rel (!%p16_p2) target bundleno = 2 (0x2), region = 164 }

</bundles_post_ra>
